<compile_context>
chip_gen: v5e
topology: v5e:2x2
jax: 0.10.0
libtpu: 0.0.40
codegen_flags: <defaults>
</compile_context>

<pallas_src>
import jax
import jax.numpy as jnp
from jax import lax
from jax.experimental import pallas as pl
from jax.experimental.pallas import tpu as pltpu


def _make_kernel(budget: float, lr: float, momentum: float, num_iters: int):
    budget = float(budget)
    lr = float(lr)
    momentum = float(momentum)

    def kernel(yhat_ref, zinit_ref, out_ref):
        Yhat = yhat_ref[...]            # (n, m) f32, items on sublanes
        Z0 = zinit_ref[...]             # (n, 1) f32
        n, m = Yhat.shape
        BIG = 1e30

        # ---- constants hoisted out of the optimization loop ---------------
        # (JAX does not CSE iota / broadcast_in_dim inside loops.)
        # sel[i, j] = 1 iff breakpoint j belongs to item i (j == i or j == i+n)
        row = lax.broadcasted_iota(jnp.int32, (n, 2 * n), 0)
        col = lax.broadcasted_iota(jnp.int32, (n, 2 * n), 1)
        sel = jnp.where((col == row) | (col == row + n), 1.0, 0.0)   # (n, 2n)
        # off[j] = 1 for the "lower" breakpoints Z_i - 1 (j >= n)
        off = jnp.where(
            lax.broadcasted_iota(jnp.int32, (1, 2 * n), 1) >= n, 1.0, 0.0)

        def grad_obj(Z):
            # q[i, j] = 1 - Z_i * Yhat[i, j]; clamp keeps 1/q well defined.
            q = jnp.maximum(1.0 - Z * Yhat, 1e-6)                    # (n, m)

            # Product over sublanes. Log-depth cyclic-roll tree when n is a
            # power of two: after log2(n) roll+mul steps every sublane holds
            # prod_i q[i, j]. XLU rolls co-issue with the VPU multiplies.
            if n > 1 and (n & (n - 1)) == 0:
                P = q
                s = n // 2
                while s >= 1:
                    P = P * pltpu.roll(P, s, axis=0)
                    s //= 2
            else:
                # Fallback serial product (broadcasts against r below).
                P = q[0:1, :]
                for i in range(1, n):
                    P = P * q[i:i + 1, :]

            # Leave-one-out product via EUP approx reciprocal + 1 Newton step.
            r = pl.reciprocal(q, approx=True)
            r = r * (2.0 - q * r)
            loo = P * r                                              # prod_{i'!=i} q
            # d obj / d Z_i = sum_j Yhat[i, j] * prod_{i'!=i} q[i', j]
            return jnp.sum(Yhat * loo, axis=1, keepdims=True)        # (n, 1)

        def project(Z):
            # Exact projection onto {0 <= Z' <= 1, sum Z' = budget} following
            # Karimi et al. 2017, Alg. 2 (the reference _project with c = 1):
            # h(alpha) = sum_i clip(Z_i - alpha, 0, 1) is piecewise linear and
            # non-increasing with breakpoints {Z_i} U {Z_i - 1}.  Evaluate h at
            # all 2n breakpoints in one lane-parallel pass, pick the bracketing
            # pair with masked min/max reductions, interpolate exactly.
            # Requires 0 < budget <= n (checked in the wrapper).
            B = jnp.sum(Z * sel, axis=0, keepdims=True) - off        # (1, 2n)
            H = jnp.sum(jnp.clip(Z - B, 0.0, 1.0),
                        axis=0, keepdims=True)                       # (1, 2n)
            ge = H >= budget
            lo = jnp.max(jnp.where(ge, B, -BIG))     # largest bp with h >= budget
            h_lo = jnp.min(jnp.where(ge, H, BIG))    # = h(lo)  (h non-increasing)
            hi = jnp.min(jnp.where(ge, BIG, B))      # smallest bp with h < budget
            h_hi = jnp.max(jnp.where(ge, -BIG, H))   # = h(hi)
            frac = (h_lo - budget) / jnp.maximum(h_lo - h_hi, 1e-12)
            alpha = lo + (hi - lo) * jnp.clip(frac, 0.0, 1.0)
            return jnp.clip(Z - alpha, 0.0, 1.0)

        def step(_, carry):
            Z, Zprev = carry
            Znew = Z + momentum * (Z - Zprev)
            g = grad_obj(Znew)                       # d obj / d Znew
            # loss = -obj  =>  Z = Znew - lr * grad(loss) = Znew + lr * grad(obj)
            return (project(Znew + lr * g), Z)

        # Fully serial dependence across iterations -> no cross-iteration ILP
        # to expose; keep the rolled loop (small instruction footprint).
        Zfinal, _ = lax.fori_loop(0, num_iters, step, (Z0, Z0))
        out_ref[...] = Zfinal

    return kernel


def submodular_optimizer(Yhat, Z_init, *, budget, lr=0.1, momentum=0.9,
                         num_iters=100):
    """Returns optimal Z (shape (n,)) for the coverage objective, like module.forward."""
    n, m = Yhat.shape
    assert 0.0 < budget <= n, "projection requires 0 < budget <= number of items"
    kernel = _make_kernel(float(budget), float(lr), float(momentum),
                          int(num_iters))
    z = pl.pallas_call(
        kernel,
        out_shape=jax.ShapeDtypeStruct((n, 1), jnp.float32),
        grid=(1,),
        in_specs=[
            pl.BlockSpec((n, m), lambda i: (0, 0)),
            pl.BlockSpec((n, 1), lambda i: (0, 0)),
        ],
        out_specs=pl.BlockSpec((n, 1), lambda i: (0, 0)),
        compiler_params=pltpu.CompilerParams(
            dimension_semantics=("arbitrary",)),
    )(Yhat.astype(jnp.float32), Z_init.reshape(n, 1).astype(jnp.float32))
    return z.reshape(n)


if __name__ == "__main__":
    key = jax.random.PRNGKey(0)
    k_y, k_z = jax.random.split(key)

    n_items, n_targets = 8, 128
    budget = 3.0

    # Coverage probabilities in (0.05, 0.5) keep 1 - Z*Yhat strictly positive.
    Yhat = 0.05 + 0.45 * jax.random.uniform(k_y, (n_items, n_targets),
                                            dtype=jnp.float32)
    # Deterministic stand-in for torch.rand(Yhat.shape[0]) default Z_init.
    # TODO(synk): the user-supplied get_obj callable of the PyTorch module is
    # not translatable generically; the coverage objective is baked in here.
    Z_init = jax.random.uniform(k_z, (n_items,), dtype=jnp.float32)

    Z = submodular_optimizer(Yhat, Z_init, budget=budget,
                             lr=0.1, momentum=0.9, num_iters=100)
    Z = jax.block_until_ready(Z)

    # Sanity: feasibility of the projected solution.
    assert Z.shape == (n_items,)
    assert jnp.all(Z >= -1e-4) and jnp.all(Z <= 1.0 + 1e-4)
    assert abs(float(jnp.sum(Z)) - budget) < 1e-2, float(jnp.sum(Z))

    print("KERNEL_OK")
</pallas_src>

<mosaic_0001>
module attributes {stable_mosaic.version = 11 : i64} {
  func.func @kernel(%arg0: i32, %arg1: memref<8x128xf32, #tpu.memory_space<vmem>>, %arg2: memref<8x1xf32, #tpu.memory_space<vmem>>, %arg3: memref<8x1xf32, #tpu.memory_space<vmem>>) attributes {dimension_semantics = [#tpu.dimension_semantics<arbitrary>], iteration_bounds = array<i64: 1>, scalar_prefetch = 0 : i64, scratch_operands = 0 : i64, tpu.core_type = #tpu.core_type<tc>, window_params = [{pipeline_mode = #tpu.pipeline_mode<synchronous>, transform_indices = @transform_0, window_bounds = array<i64: 8, 128>}, {pipeline_mode = #tpu.pipeline_mode<synchronous>, transform_indices = @transform_1, window_bounds = array<i64: 8, 1>}, {pipeline_mode = #tpu.pipeline_mode<synchronous>, transform_indices = @transform_2, window_bounds = array<i64: 8, 1>}]} {
    %c0 = arith.constant 0 : index
    %c0_0 = arith.constant 0 : index
    %0 = vector.load %arg1[%c0, %c0_0] : memref<8x128xf32, #tpu.memory_space<vmem>>, vector<8x128xf32>
    %c0_1 = arith.constant 0 : index
    %c0_2 = arith.constant 0 : index
    %1 = vector.load %arg2[%c0_1, %c0_2] : memref<8x1xf32, #tpu.memory_space<vmem>>, vector<8x1xf32>
    %2 = tpu.iota {dimensions = array<i32: 0>} : vector<8x16xi32>
    %3 = tpu.iota {dimensions = array<i32: 1>} : vector<8x16xi32>
    %4 = arith.cmpi eq, %3, %2 : vector<8x16xi32>
    %c8_i32 = arith.constant 8 : i32
    %5 = vector.broadcast %c8_i32 : i32 to vector<8x16xi32>
    %6 = arith.addi %2, %5 : vector<8x16xi32>
    %7 = arith.cmpi eq, %3, %6 : vector<8x16xi32>
    %8 = arith.ori %4, %7 : vector<8x16xi1>
    %cst = arith.constant 1.000000e+00 : f32
    %cst_3 = arith.constant 0.000000e+00 : f32
    %9 = vector.broadcast %cst : f32 to vector<8x16xf32>
    %10 = vector.broadcast %cst_3 : f32 to vector<8x16xf32>
    %11 = arith.select %8, %9, %10 : vector<8x16xi1>, vector<8x16xf32>
    %12 = tpu.iota {dimensions = array<i32: 1>} : vector<1x16xi32>
    %c8_i32_4 = arith.constant 8 : i32
    %13 = vector.broadcast %c8_i32_4 : i32 to vector<1x16xi32>
    %14 = arith.cmpi sge, %12, %13 : vector<1x16xi32>
    %cst_5 = arith.constant 1.000000e+00 : f32
    %cst_6 = arith.constant 0.000000e+00 : f32
    %15 = vector.broadcast %cst_5 : f32 to vector<1x16xf32>
    %16 = vector.broadcast %cst_6 : f32 to vector<1x16xf32>
    %17 = arith.select %14, %15, %16 : vector<1x16xi1>, vector<1x16xf32>
    %c0_i32 = arith.constant 0 : i32
    %c100_i32 = arith.constant 100 : i32
    %18 = arith.addi %c0_i32, %c100_i32 : i32
    %c1_i32 = arith.constant 1 : i32
    %19:2 = scf.for %arg4 = %c0_i32 to %18 step %c1_i32 iter_args(%arg5 = %1, %arg6 = %1) -> (vector<8x1xf32>, vector<8x1xf32>)  : i32 {
      %21 = arith.subf %arg5, %arg6 : vector<8x1xf32>
      %cst_9 = arith.constant 0.899999976 : f32
      %22 = vector.broadcast %cst_9 : f32 to vector<8x1xf32>
      %23 = arith.mulf %22, %21 : vector<8x1xf32>
      %24 = arith.addf %arg5, %23 : vector<8x1xf32>
      %25 = vector.broadcast %24 : vector<8x1xf32> to vector<8x128xf32>
      %26 = arith.mulf %25, %0 : vector<8x128xf32>
      %cst_10 = arith.constant 1.000000e+00 : f32
      %27 = vector.broadcast %cst_10 : f32 to vector<8x128xf32>
      %28 = arith.subf %27, %26 : vector<8x128xf32>
      %cst_11 = arith.constant 9.99999997E-7 : f32
      %29 = vector.broadcast %cst_11 : f32 to vector<8x128xf32>
      %30 = arith.maximumf %28, %29 : vector<8x128xf32>
      %c4_i32 = arith.constant 4 : i32
      %31 = tpu.dynamic_rotate %30 by %c4_i32 dim 0 : vector<8x128xf32>, i32 -> vector<8x128xf32>
      %32 = arith.mulf %30, %31 : vector<8x128xf32>
      %c2_i32 = arith.constant 2 : i32
      %33 = tpu.dynamic_rotate %32 by %c2_i32 dim 0 : vector<8x128xf32>, i32 -> vector<8x128xf32>
      %34 = arith.mulf %32, %33 : vector<8x128xf32>
      %c1_i32_12 = arith.constant 1 : i32
      %35 = tpu.dynamic_rotate %34 by %c1_i32_12 dim 0 : vector<8x128xf32>, i32 -> vector<8x128xf32>
      %36 = arith.mulf %34, %35 : vector<8x128xf32>
      %37 = tpu.reciprocal %30 {approx = true} : vector<8x128xf32> -> vector<8x128xf32>
      %38 = arith.mulf %30, %37 : vector<8x128xf32>
      %cst_13 = arith.constant 2.000000e+00 : f32
      %39 = vector.broadcast %cst_13 : f32 to vector<8x128xf32>
      %40 = arith.subf %39, %38 : vector<8x128xf32>
      %41 = arith.mulf %37, %40 : vector<8x128xf32>
      %42 = arith.mulf %36, %41 : vector<8x128xf32>
      %43 = arith.mulf %0, %42 : vector<8x128xf32>
      %cst_14 = arith.constant dense<0.000000e+00> : vector<8xf32>
      %44 = vector.multi_reduction <add>, %43, %cst_14 [1] : vector<8x128xf32> to vector<8xf32>
      %45 = vector.shape_cast %44 : vector<8xf32> to vector<8x1xf32>
      %cst_15 = arith.constant 1.000000e-01 : f32
      %46 = vector.broadcast %cst_15 : f32 to vector<8x1xf32>
      %47 = arith.mulf %46, %45 : vector<8x1xf32>
      %48 = arith.addf %24, %47 : vector<8x1xf32>
      %49 = vector.broadcast %48 : vector<8x1xf32> to vector<8x16xf32>
      %50 = arith.mulf %49, %11 : vector<8x16xf32>
      %cst_16 = arith.constant dense<0.000000e+00> : vector<16xf32>
      %51 = vector.multi_reduction <add>, %50, %cst_16 [0] : vector<8x16xf32> to vector<16xf32>
      %52 = vector.shape_cast %51 : vector<16xf32> to vector<1x16xf32>
      %53 = arith.subf %52, %17 : vector<1x16xf32>
      %54 = vector.broadcast %48 : vector<8x1xf32> to vector<8x16xf32>
      %55 = vector.broadcast %53 : vector<1x16xf32> to vector<8x16xf32>
      %56 = arith.subf %54, %55 : vector<8x16xf32>
      %cst_17 = arith.constant 0.000000e+00 : f32
      %cst_18 = arith.constant 1.000000e+00 : f32
      %57 = vector.broadcast %cst_17 : f32 to vector<8x16xf32>
      %58 = arith.maximumf %57, %56 : vector<8x16xf32>
      %59 = vector.broadcast %cst_18 : f32 to vector<8x16xf32>
      %60 = arith.minimumf %59, %58 : vector<8x16xf32>
      %cst_19 = arith.constant dense<0.000000e+00> : vector<16xf32>
      %61 = vector.multi_reduction <add>, %60, %cst_19 [0] : vector<8x16xf32> to vector<16xf32>
      %62 = vector.shape_cast %61 : vector<16xf32> to vector<1x16xf32>
      %cst_20 = arith.constant 3.000000e+00 : f32
      %63 = vector.broadcast %cst_20 : f32 to vector<1x16xf32>
      %64 = arith.cmpf oge, %62, %63 : vector<1x16xf32>
      %cst_21 = arith.constant -1.000000e+30 : f32
      %65 = vector.broadcast %cst_21 : f32 to vector<1x16xf32>
      %66 = arith.select %64, %53, %65 : vector<1x16xi1>, vector<1x16xf32>
      %67 = vector.shape_cast %66 : vector<1x16xf32> to vector<1x1x16xf32>
      %cst_22 = arith.constant dense<0xFF800000> : vector<1xf32>
      %68 = vector.multi_reduction <maximumf>, %67, %cst_22 [1, 2] : vector<1x1x16xf32> to vector<1xf32>
      %69 = vector.shape_cast %68 : vector<1xf32> to vector<1x1x1xf32>
      %70 = vector.extract %69[0, 0, 0] : f32 from vector<1x1x1xf32>
      %cst_23 = arith.constant 1.000000e+30 : f32
      %71 = vector.broadcast %cst_23 : f32 to vector<1x16xf32>
      %72 = arith.select %64, %62, %71 : vector<1x16xi1>, vector<1x16xf32>
      %73 = vector.shape_cast %72 : vector<1x16xf32> to vector<1x1x16xf32>
      %cst_24 = arith.constant dense<0x7F800000> : vector<1xf32>
      %74 = vector.multi_reduction <minimumf>, %73, %cst_24 [1, 2] : vector<1x1x16xf32> to vector<1xf32>
      %75 = vector.shape_cast %74 : vector<1xf32> to vector<1x1x1xf32>
      %76 = vector.extract %75[0, 0, 0] : f32 from vector<1x1x1xf32>
      %cst_25 = arith.constant 1.000000e+30 : f32
      %77 = vector.broadcast %cst_25 : f32 to vector<1x16xf32>
      %78 = arith.select %64, %77, %53 : vector<1x16xi1>, vector<1x16xf32>
      %79 = vector.shape_cast %78 : vector<1x16xf32> to vector<1x1x16xf32>
      %cst_26 = arith.constant dense<0x7F800000> : vector<1xf32>
      %80 = vector.multi_reduction <minimumf>, %79, %cst_26 [1, 2] : vector<1x1x16xf32> to vector<1xf32>
      %81 = vector.shape_cast %80 : vector<1xf32> to vector<1x1x1xf32>
      %82 = vector.extract %81[0, 0, 0] : f32 from vector<1x1x1xf32>
      %cst_27 = arith.constant -1.000000e+30 : f32
      %83 = vector.broadcast %cst_27 : f32 to vector<1x16xf32>
      %84 = arith.select %64, %83, %62 : vector<1x16xi1>, vector<1x16xf32>
      %85 = vector.shape_cast %84 : vector<1x16xf32> to vector<1x1x16xf32>
      %cst_28 = arith.constant dense<0xFF800000> : vector<1xf32>
      %86 = vector.multi_reduction <maximumf>, %85, %cst_28 [1, 2] : vector<1x1x16xf32> to vector<1xf32>
      %87 = vector.shape_cast %86 : vector<1xf32> to vector<1x1x1xf32>
      %88 = vector.extract %87[0, 0, 0] : f32 from vector<1x1x1xf32>
      %cst_29 = arith.constant 3.000000e+00 : f32
      %89 = arith.subf %76, %cst_29 : f32
      %90 = arith.subf %76, %88 : f32
      %cst_30 = arith.constant 9.99999996E-13 : f32
      %91 = arith.maximumf %90, %cst_30 : f32
      %92 = arith.divf %89, %91 : f32
      %93 = arith.subf %82, %70 : f32
      %cst_31 = arith.constant 0.000000e+00 : f32
      %cst_32 = arith.constant 1.000000e+00 : f32
      %94 = arith.maximumf %cst_31, %92 : f32
      %95 = arith.minimumf %cst_32, %94 : f32
      %96 = arith.mulf %93, %95 : f32
      %97 = arith.addf %70, %96 : f32
      %98 = vector.broadcast %97 : f32 to vector<8x1xf32>
      %99 = arith.subf %48, %98 : vector<8x1xf32>
      %cst_33 = arith.constant 0.000000e+00 : f32
      %cst_34 = arith.constant 1.000000e+00 : f32
      %100 = vector.broadcast %cst_33 : f32 to vector<8x1xf32>
      %101 = arith.maximumf %100, %99 : vector<8x1xf32>
      %102 = vector.broadcast %cst_34 : f32 to vector<8x1xf32>
      %103 = arith.minimumf %102, %101 : vector<8x1xf32>
      scf.yield %103, %arg5 : vector<8x1xf32>, vector<8x1xf32>
    }
    %c0_7 = arith.constant 0 : index
    %c0_8 = arith.constant 0 : index
    %20 = vector.load %arg3[%c0_7, %c0_8] : memref<8x1xf32, #tpu.memory_space<vmem>>, vector<8x1xf32>
    tpu.vector_store %arg3[%c0_7, %c0_8], %19#0 {strides = array<i32>} : memref<8x1xf32, #tpu.memory_space<vmem>>, vector<8x1xf32>,
    return
  }
  func.func @transform_0(%arg0: i32) -> (i32, i32) {
    %c0_i32 = arith.constant 0 : i32
    %c0_i32_0 = arith.constant 0 : i32
    %c0_i32_1 = arith.constant 0 : i32
    return %c0_i32, %c0_i32_0 : i32, i32
  }
  func.func @transform_1(%arg0: i32) -> (i32, i32) {
    %c0_i32 = arith.constant 0 : i32
    %c0_i32_0 = arith.constant 0 : i32
    %c0_i32_1 = arith.constant 0 : i32
    return %c0_i32, %c0_i32_0 : i32, i32
  }
  func.func @transform_2(%arg0: i32) -> (i32, i32) {
    %c0_i32 = arith.constant 0 : i32
    %c0_i32_0 = arith.constant 0 : i32
    %c0_i32_1 = arith.constant 0 : i32
    return %c0_i32, %c0_i32_0 : i32, i32
  }
}

</mosaic_0001>

<bundles_post_ra>
// kernel: tpu_custom_call.1
= control target key start
LH: loop header
LB: loop body
LE: loop exit
PB: predicated region body
PF: predicated region fallthrough
CT: control target
= control target key end

     0   :  { %v13_v0 = vlaneseq  ;;  %v221_v6 = vmov 0.0   ;;  %s300_s0 = inlined_call_operand.vmem [shape: f32[8,128], index: 0, kind: input, shape index: {}]   ;;  %s301_s1 = inlined_call_operand.vmem [shape: f32[8,1], index: 1, kind: input, shape index: {}]   ;;  %s302_s2 = inlined_call_operand.vmem [shape: f32[8,1], index: 2, kind: output, shape index: {}]  }
   0x1   :  { %v244_v1 = vld [vmem:[%s300_s0] sm:$0xff]  ;;  %s257_s0 = smov 0  }
   0x2   :  { %v12_v2 = vld [vmem:[%s301_s1] sm:$0xff]   ;;  %v14_v3 = vshrl.u32 %v13_v0, 7  ;;  %v16_v4 = vand.u32 127, %v13_v0 }
   0x3   :  { %v303_v9 = vmov %v12_v2 }
   0x4   :  { %vm17_vm0 = vcmp.eq.s32.totalorder %v16_v4, %v14_v3  ;;  %v18_v5 = vadd.s32 8, %v14_v3  ;;  %vm22_vm1 = vcmp.ge.s32.totalorder %v16_v4, 8 }
   0x5   :  { %v249_v7 = vsel %vm22_vm1, 1.0, %v221_v6 }
   0x6   :  { %vm19_vm2 = vcmp.eq.s32.totalorder %v16_v4, %v18_v5 }
   0x7   :  { %vm20_vm3 = vmor %vm17_vm0, %vm19_vm2 }
   0x8   :  { %v251_v8 = vsel %vm20_vm3, 1.0, %v221_v6 }
   0x9 LB: > { %v222_v10 = vmov 0   ;;  %v32_v11 = vsub.f32 %v215_v2, %v211_v9  ;;  %vm65_vm4 = vcmask 130048   ;;  %s223_s17 = smov 1e-12   ;;  %s224_s23 = smov 0.0   ;;  %s219_s0 = sphi %s257_s0, %s29_s0   ;;  %v215_v2 = vphi %v12_v2, %v305_v2   ;;  %v211_v9 = vphi %v303_v9, %v304_v9  }
   0xa   : > { %191 = vset.pattern.permute.xlu0 %v222_v10  ;;  %192 = vset.pattern.permute.xlu1 %v222_v10  ;;  %s225_s25 = smov 1.0   ;;  %s29_s0 = sadd.s32 1, %s219_s0  }
   0xb   : > { %v33_v12 = vmul.f32 0.9, %v32_v11  ;;  %p26_p0 = scmp.ge.s32.totalorder %s29_s0, 100  }
   0xc   :  { %vm134_vm10 = vcmask (%p26_p0), 7168  }
   0xd   : > { %v34_v13 = vadd.f32 %v215_v2, %v33_v12 }
   0xf   : > { %37 = vperm.xlu0 %191, %v34_v13  }
  0x81   : > { %v38_v14 = vpop.permute.xlu0 %37 }
  0x82   : > { %v40_v15 = vmul.f32 %v38_v14, %v244_v1 }
  0x84   : > { %v41_v16 = vsub.f32 1.0, %v40_v15 }
  0x86   : > { %v42_v17 = vmax.f32 %v41_v16, 1e-06 }
  0x88   : > { %v43_v18 = vrot.slane %v42_v17, 4  ;;  %193 = vrcp.f32 %v42_v17 }
  0x8a   : > { %v44_v19 = vmul.f32 %v43_v18, %v42_v17 }
  0x8c   : > { %v45_v20 = vrot.slane %v44_v19, 6 }
  0x8e   : > { %v194_v21 = vpop.eup %193  ;;  %v46_v22 = vmul.f32 %v45_v20, %v44_v19 }
  0x8f   : > { %v50_v23 = vmul.f32 %v194_v21, %v42_v17 }
  0x90   : > { %v47_v24 = vrot.slane %v46_v22, 7 }
  0x91   : > { %v51_v25 = vsub.f32 2.0, %v50_v23 }
  0x92   : > { %v48_v26 = vmul.f32 %v47_v24, %v46_v22 }
  0x93   : > { %v52_v27 = vmul.f32 %v194_v21, %v51_v25 }
  0x95   : > { %v53_v28 = vmul.f32 %v52_v27, %v48_v26 }
  0x97   : > { %v54_v29 = vmul.f32 %v53_v28, %v244_v1 }
  0x99   : > { %55 = vadd.xlane.f32.xlu0 %v54_v29 }
 0x10c   : > { %v56_v30 = vpop.xlane.xlu0 %55 }
 0x10d   : > { %v57_v31 = vmul.f32 0.1, %v56_v30 }
 0x10f   : > { %v270_v32 = vadd.f32 %v57_v31, %v34_v13 }
 0x111   : > { %61 = vperm.xlu1 %192, %v270_v32  }
 0x183   : > { %v62_v33 = vpop.permute.xlu1 %61 }
 0x184   : > { %v64_v34 = vmul.f32 %v62_v33, %v251_v8 }
 0x186   : > { %v66_v35 = vsel %vm65_vm4, %v64_v34, 0.0 }
 0x187   : > { %v67_v36 = vrot.slane %v66_v35, 4 }
 0x189   : > { %v68_v37 = vadd.f32 %v67_v36, %v66_v35 }
 0x18b   : > { %v69_v38 = vrot.slane %v68_v37, 2 }
 0x18d   : > { %v70_v39 = vadd.f32 %v69_v38, %v68_v37 }
 0x18f   : > { %v71_v40 = vrot.slane %v70_v39, 1 }
 0x191   : > { %v72_v41 = vadd.f32 %v71_v40, %v70_v39 }
 0x193   : > { %v73_v42 = vsub.f32 %v72_v41, %v249_v7 }
 0x195   : > { %v74_v43 = vsub.f32 %v62_v33, %v73_v42 }
 0x197   : > { %v75_v44 = vmax.f32 %v74_v43, 0.0 }
 0x199   : > { %v76_v45 = vmin.f32 %v75_v44, 1.0 }
 0x19b   : > { %v77_v46 = vsel %vm65_vm4, %v76_v45, 0.0 }
 0x19c   : > { %v78_v47 = vrot.slane %v77_v46, 4 }
 0x19e   : > { %v79_v48 = vadd.f32 %v78_v47, %v77_v46 }
 0x1a0   : > { %v80_v49 = vrot.slane %v79_v48, 2 }
 0x1a2   : > { %v81_v50 = vadd.f32 %v80_v49, %v79_v48 }
 0x1a4   : > { %v82_v51 = vrot.slane %v81_v50, 1 }
 0x1a6   : > { %v83_v52 = vadd.f32 %v82_v51, %v81_v50 }
 0x1a8   : > { %vm84_vm5 = vcmp.ge.f32.partialorder %v83_v52, 3.0 }
 0x1a9   : > { %v90_v53 = vsel %vm84_vm5, %v83_v52, 1e+30  ;;  %v85_v54 = vsel %vm84_vm5, %v73_v42, -1e+30  ;;  %v95_v57 = vsel %vm84_vm5, 1e+30, %v73_v42 }
 0x1aa   : > { %v91_v55 = vsel %vm65_vm4, %v90_v53, inf  ;;  %v86_v56 = vsel %vm65_vm4, %v85_v54, -inf  ;;  %v96_v58 = vsel %vm65_vm4, %v95_v57, inf  ;;  %v100_v59 = vsel %vm84_vm5, -1e+30, %v83_v52 }
 0x1ab   : > { %92 = vmin.xlane.f32.xlu2 %v91_v55  ;;  %87 = vmax.xlane.f32.xlu1 %v86_v56  ;;  %v101_v60 = vsel %vm65_vm4, %v100_v59, -inf }
 0x1b3   : > { %97 = vmin.xlane.f32.xlu2 %v96_v58 }
 0x1bb   : > { %102 = vmax.xlane.f32.xlu2 %v101_v60 }
 0x21e   : > { %v93_v61 = vpop.xlane.xlu2 %92  ;;  %v88_v62 = vpop.xlane.xlu1 %87 }
 0x21f   : > { %152 = vpush %v88_v62 }
 0x220   : > { %154 = vpush %v93_v61 }
 0x226   : > { %v98_v63 = vpop.xlane.xlu2 %97 }
 0x227   : > { %156 = vpush %v98_v63 }
 0x22e   : > { %v103_v0 = vpop.xlane.xlu2 %102 }
 0x22f   : > { %158 = vpush %v103_v0 }
 0x250   : > { %s281_s1 = spop %152 }
 0x251   : > { %s155_s13 = spop %154 }
 0x252   : > { %s151_s19 = sadd.f32 -3.0, %s155_s13 }
 0x258   : > { %s283_s14 = spop %156 }
 0x259   : > { %s125_s22 = ssub.f32 %s283_s14, %s281_s1 }
 0x260   : > { %s159_s15 = spop %158 }
 0x261   : > { %s106_s16 = ssub.f32 %s155_s13, %s159_s15 }
 0x263   : > { %s107_s18 = smax.f32 %s223_s17, %s106_s16 }
 0x264   : > { %v108_v3 = vstv %s107_s18 }
 0x265   : > { %195 = vrcp.f32 %v108_v3  ;;  %v120_v9 = vand.u32 2147483648, %v108_v3  ;;  %v118_v11 = vand.u32 2147483647, %v108_v3  ;;  %vm114_vm7 = vweird.f32 %v108_v3 }
 0x267   : > { %v121_v13 = vor.u32 1.1754944e-38, %v120_v9  ;;  %vm119_vm9 = vcmp.eq.f32.partialorder %v118_v11, 8.507059e+37  ;;  %v304_v9 = vmov %v215_v2 }
 0x26b   : > { %v196_v4 = vpop.eup %195 }
 0x26c   : > { %v110_v5 = vmul.f32 %v196_v4, %v108_v3  ;;  %vm115_vm6 = vweird.f32 %v196_v4 }
 0x26d   : > { %vm116_vm8 = vmor %vm114_vm7, %vm115_vm6 }
 0x26e   : > { %v111_v6 = vsub.f32 1.0, %v110_v5 }
 0x270   : > { %v112_v10 = vmul.f32 %v196_v4, %v111_v6 }
 0x272   : > { %v113_v12 = vadd.f32 %v196_v4, %v112_v10 }
 0x274   : > { %v117_v14 = vsel %vm116_vm8, %v196_v4, %v113_v12 }
 0x275   : > { %v122_v15 = vsel %vm119_vm9, %v121_v13, %v117_v14 }
 0x276   : > { %160 = vpush %v122_v15 }
 0x2a7   : > { %s161_s20 = spop %160 }
 0x2a8   : > { %s124_s21 = smul.f32 %s161_s20, %s151_s19 }
 0x2aa   : > { %s126_s24 = smax.f32 %s224_s23, %s124_s21 }
 0x2ab   : > { %s127_s26 = smin.f32 %s225_s25, %s126_s24 }
 0x2ac   : > { %s128_s27 = smul.f32 %s127_s26, %s125_s22 }
 0x2ae   : > { %s129_s28 = sadd.f32 %s281_s1, %s128_s27 }
 0x2b0   : > { %v130_v16 = vstv %s129_s28 }
 0x2b1   : > { %v131_v17 = vsub.f32 %v270_v32, %v130_v16 }
 0x2b3   : > { %v132_v18 = vmax.f32 %v131_v17, 0.0  ;;  %28 = sbr.rel (!%p26_p0) target bundleno = 9 (0x9), region = 35 }
 0x2b5   : > { %v133_v19 = vmin.f32 %v132_v18, 1.0  }
 0x2b7   : > { %v305_v2 = vmov %v133_v19  ;;  %135 = vst.msk [vmem:[%s302_s2] sm:$0xff] (%p26_p0), %vm134_vm10, %v133_v19 }

</bundles_post_ra>
